<compile_context>
chip_gen: v7x
topology: tpu7x:2x2x1
jax: 0.10.0
libtpu: 0.0.40
codegen_flags: <defaults>
</compile_context>

<pallas_src>
import math
import functools

import jax
import jax.numpy as jnp
from jax.experimental import pallas as pl
from jax.experimental.pallas import tpu as pltpu


# ---------------------------------------------------------------------------
# Parameter (buffer) construction — deterministic, mirrors nn.Module.__init__
# ---------------------------------------------------------------------------
def make_positional_encoding(d_model: int, max_len: int = 5000) -> jnp.ndarray:
    """Returns pe of shape [max_len, d_model] (the middle batch dim squeezed)."""
    position = jnp.arange(max_len, dtype=jnp.float32)[:, None]            # [L, 1]
    div_term = jnp.exp(
        jnp.arange(0, d_model, 2, dtype=jnp.float32)
        * (-math.log(10000.0) / d_model)
    )                                                                      # [D/2]
    pe = jnp.zeros((max_len, d_model), dtype=jnp.float32)
    pe = pe.at[:, 0::2].set(jnp.sin(position * div_term))
    pe = pe.at[:, 1::2].set(jnp.cos(position * div_term))
    return pe


# ---------------------------------------------------------------------------
# Kernel helpers
# ---------------------------------------------------------------------------
def _tile_cols(a, reps: int):
    """Repeat a (T, D) block `reps` times along the lane axis -> (T, reps*D).

    Matches the row-major [seq, batch, d_model] -> [seq, batch*d_model] view:
    column j corresponds to (b = j // D, d = j % D), so pe must be tiled.
    """
    if reps == 1:
        return a
    return jnp.tile(a, (1, reps))


def _fmix32(h):
    """murmur3 finalizer — cheap, well-mixed per-element hash for dropout."""
    h = h ^ (h >> jnp.uint32(16))
    h = h * jnp.uint32(0x7FEB352D)
    h = h ^ (h >> jnp.uint32(15))
    h = h * jnp.uint32(0x846CA68B)
    h = h ^ (h >> jnp.uint32(16))
    return h


# ---------------------------------------------------------------------------
# Kernels
# ---------------------------------------------------------------------------
def _pos_enc_eval_kernel(x_ref, pe_ref, o_ref, *, batch: int):
    # x_ref/o_ref: (tile_seq, batch*d_model); pe_ref: (tile_seq, d_model)
    y = x_ref[...] + _tile_cols(pe_ref[...], batch)
    o_ref[...] = y.astype(o_ref.dtype)


def _pos_enc_train_kernel(seed_ref, x_ref, pe_ref, o_ref, *, p: float, batch: int):
    # Add positional encoding (f32 accumulate), then inverted dropout.
    y = x_ref[...] + _tile_cols(pe_ref[...], batch)

    # Stateless per-element random bits: hash(global linear index, seed).
    tile_rows, cols = y.shape
    row0 = pl.program_id(0) * tile_rows
    r = jax.lax.broadcasted_iota(jnp.int32, (tile_rows, cols), 0) + row0
    c = jax.lax.broadcasted_iota(jnp.int32, (tile_rows, cols), 1)
    idx = (r * cols + c).astype(jnp.uint32)
    seed = seed_ref[0].astype(jnp.uint32)
    h = _fmix32(idx * jnp.uint32(0x9E3779B1) + seed * jnp.uint32(0x85EBCA77))

    # Integer-threshold compare: drop with probability p, keep with 1-p.
    thresh = jnp.uint32(min(0xFFFFFFFF, int(round(p * 2.0 ** 32))))
    keep = h >= thresh
    scale = jnp.float32(1.0 / (1.0 - p))
    o_ref[...] = jnp.where(keep, y * scale, jnp.float32(0.0)).astype(o_ref.dtype)


# ---------------------------------------------------------------------------
# Tiling helper: pick tile_seq from a byte budget (~2 MiB per x block),
# aligned to the dtype's sublane multiple (8 for f32, 16 for bf16, 32 for i8).
# ---------------------------------------------------------------------------
def _choose_tile_seq(seq: int, row_bytes: int, itemsize: int,
                     target_bytes: int = 2 * 1024 * 1024) -> int:
    sublane = max(8, 32 // max(itemsize, 1))
    tile = max(1, target_bytes // max(row_bytes, 1))
    tile = min(tile, seq)
    # Keep sublane alignment so the BlockSpecs stay legal even when a block
    # does not cover the whole buffer; edge blocks are masked by Pallas.
    tile = max(sublane, (tile // sublane) * sublane)
    return tile


# ---------------------------------------------------------------------------
# Wrappers
# ---------------------------------------------------------------------------
def positional_encoding_eval(x: jnp.ndarray, pe: jnp.ndarray) -> jnp.ndarray:
    """Eval-mode forward (dropout is identity).

    x: [seq, batch, d_model]; pe: [max_len, d_model] with max_len >= seq.
    """
    seq, batch, d_model = x.shape
    assert pe.shape[0] >= seq and pe.shape[1] == d_model
    cols = batch * d_model
    x2 = x.reshape(seq, cols)  # free row-major reshape -> lane-dense layout
    tile_seq = _choose_tile_seq(seq, cols * x2.dtype.itemsize, x2.dtype.itemsize)
    grid = (pl.cdiv(seq, tile_seq),)
    kernel = functools.partial(_pos_enc_eval_kernel, batch=batch)
    out2 = pl.pallas_call(
        kernel,
        out_shape=jax.ShapeDtypeStruct((seq, cols), x.dtype),
        grid_spec=pltpu.PrefetchScalarGridSpec(
            num_scalar_prefetch=0,
            grid=grid,
            in_specs=[
                pl.BlockSpec((tile_seq, cols), lambda i: (i, 0)),
                # full pe buffer in HBM; rows selected via index_map (no copy)
                pl.BlockSpec((tile_seq, d_model), lambda i: (i, 0)),
            ],
            out_specs=pl.BlockSpec((tile_seq, cols), lambda i: (i, 0)),
        ),
        compiler_params=pltpu.CompilerParams(
            dimension_semantics=("parallel",),
            vmem_limit_bytes=32 * 1024 * 1024,
        ),
    )(x2, pe)
    return out2.reshape(seq, batch, d_model)


def positional_encoding_train(
    x: jnp.ndarray, pe: jnp.ndarray, seed: int, p: float = 0.1
) -> jnp.ndarray:
    """Training-mode forward: add PE then apply dropout(p) inside the kernel."""
    seq, batch, d_model = x.shape
    assert pe.shape[0] >= seq and pe.shape[1] == d_model
    if p <= 0.0:
        return positional_encoding_eval(x, pe)
    cols = batch * d_model
    x2 = x.reshape(seq, cols)
    tile_seq = _choose_tile_seq(seq, cols * x2.dtype.itemsize, x2.dtype.itemsize)
    grid = (pl.cdiv(seq, tile_seq),)
    seed_arr = jnp.array([seed], dtype=jnp.int32)
    kernel = functools.partial(_pos_enc_train_kernel, p=p, batch=batch)
    out2 = pl.pallas_call(
        kernel,
        out_shape=jax.ShapeDtypeStruct((seq, cols), x.dtype),
        grid_spec=pltpu.PrefetchScalarGridSpec(
            num_scalar_prefetch=1,  # seed -> SMEM, passed first to the kernel
            grid=grid,
            in_specs=[
                pl.BlockSpec((tile_seq, cols), lambda i, seed_ref: (i, 0)),
                pl.BlockSpec((tile_seq, d_model), lambda i, seed_ref: (i, 0)),
            ],
            out_specs=pl.BlockSpec((tile_seq, cols), lambda i, seed_ref: (i, 0)),
        ),
        compiler_params=pltpu.CompilerParams(
            # mask is a pure function of (global index, seed) => grid-invariant,
            # so the axis is safely parallel (shards across v7x's 2 TCs).
            dimension_semantics=("parallel",),
            vmem_limit_bytes=32 * 1024 * 1024,
        ),
    )(seed_arr, x2, pe)
    return out2.reshape(seq, batch, d_model)


# ---------------------------------------------------------------------------
if __name__ == "__main__":
    d_model = 32
    seq_len = 8
    batch = 2
    max_len = 64  # small synthetic buffer (module default is 5000)

    key = jax.random.PRNGKey(0)
    x = jax.random.normal(key, (seq_len, batch, d_model), dtype=jnp.float32)

    pe = make_positional_encoding(d_model, max_len=max_len)
    ref = x + pe[:seq_len][:, None, :]

    # Eval-mode forward (dropout is identity): exact check against reference.
    out_eval = positional_encoding_eval(x, pe)
    jax.block_until_ready(out_eval)
    assert out_eval.shape == (seq_len, batch, d_model)
    assert out_eval.dtype == x.dtype
    assert jnp.allclose(out_eval, ref, atol=1e-6, rtol=1e-6), "eval mismatch"

    # Training-mode forward (dropout p=0.1 applied inside the kernel).
    p = 0.1
    out_train = positional_encoding_train(x, pe, seed=0, p=p)
    jax.block_until_ready(out_train)
    assert out_train.shape == (seq_len, batch, d_model)
    # dropped elements are exactly zero, kept elements are ref / (1-p)
    kept = out_train != 0
    assert bool(jnp.any(kept)), "dropout dropped everything"
    assert jnp.allclose(
        jnp.where(kept, out_train, 0.0),
        jnp.where(kept, ref / (1.0 - p), 0.0),
        atol=1e-5, rtol=1e-5,
    ), "train mismatch"

    print("KERNEL_OK")
</pallas_src>

<mosaic_0001>
module attributes {stable_mosaic.version = 11 : i64} {
  func.func @_pos_enc_eval_kernel(%arg0: i32, %arg1: memref<8x64xf32, #tpu.memory_space<vmem>>, %arg2: memref<8x32xf32, #tpu.memory_space<vmem>>, %arg3: memref<8x64xf32, #tpu.memory_space<vmem>>) attributes {dimension_semantics = [#tpu.dimension_semantics<parallel>], iteration_bounds = array<i64: 1>, scalar_prefetch = 0 : i64, scratch_operands = 0 : i64, tpu.core_type = #tpu.core_type<tc>, window_params = [{transform_indices = @transform_0, window_bounds = array<i64: 8, 64>}, {transform_indices = @transform_1, window_bounds = array<i64: 8, 32>}, {transform_indices = @transform_2, window_bounds = array<i64: 8, 64>}]} {
    %c0 = arith.constant 0 : index
    %c0_0 = arith.constant 0 : index
    %0 = vector.load %arg1[%c0, %c0_0] : memref<8x64xf32, #tpu.memory_space<vmem>>, vector<8x64xf32>
    %c0_1 = arith.constant 0 : index
    %c0_2 = arith.constant 0 : index
    %1 = vector.load %arg2[%c0_1, %c0_2] : memref<8x32xf32, #tpu.memory_space<vmem>>, vector<8x32xf32>
    %2 = tpu.concatenate %1, %1 in 1 : vector<8x32xf32>, vector<8x32xf32> -> vector<8x64xf32>
    %3 = arith.addf %0, %2 : vector<8x64xf32>
    %c0_3 = arith.constant 0 : index
    %c0_4 = arith.constant 0 : index
    %4 = vector.load %arg3[%c0_3, %c0_4] : memref<8x64xf32, #tpu.memory_space<vmem>>, vector<8x64xf32>
    tpu.vector_store %arg3[%c0_3, %c0_4], %3 {strides = array<i32>} : memref<8x64xf32, #tpu.memory_space<vmem>>, vector<8x64xf32>,
    return
  }
  func.func @transform_0(%arg0: i32) -> (i32, i32) {
    %c0_i32 = arith.constant 0 : i32
    %c0_i32_0 = arith.constant 0 : i32
    return %arg0, %c0_i32 : i32, i32
  }
  func.func @transform_1(%arg0: i32) -> (i32, i32) {
    %c0_i32 = arith.constant 0 : i32
    %c0_i32_0 = arith.constant 0 : i32
    return %arg0, %c0_i32 : i32, i32
  }
  func.func @transform_2(%arg0: i32) -> (i32, i32) {
    %c0_i32 = arith.constant 0 : i32
    %c0_i32_0 = arith.constant 0 : i32
    return %arg0, %c0_i32 : i32, i32
  }
}

</mosaic_0001>

<bundles_post_ra>
// kernel: tpu_custom_call.1
= control target key start
LH: loop header
LB: loop body
LE: loop exit
PB: predicated region body
PF: predicated region fallthrough
CT: control target
= control target key end

     0   :  { %s98_s0 = inlined_call_operand.vmem [shape: f32[8,64], index: 0, kind: input, shape index: {}]   ;;  %s99_s1 = inlined_call_operand.vmem [shape: f32[64,32], index: 1, kind: input, shape index: {}]   ;;  %s100_s2 = inlined_call_operand.hbm [shape: f32[8,64], index: 2, kind: output, shape index: {}]  }
   0x1   :  { %v13_v0 = vld [vmem:[%s99_s1] sm:$0xff] }
   0x2   :  { %7 = vsyncpa [#allocation3], 0  ;;  %s63_s11 = smov 32   ;;  %vm18_vm0 = vcmask 261120   ;;  %v12_v1 = vld [vmem:[%s98_s0] sm:$0xff]  ;;  %s64_s14 = smov [#allocation2]  }
   0x3   :  { %15 = vrot.lane.b32.xlu0 %v13_v0, %s63_s11  ;;  %s29_s15 = sshll.u32 %s64_s14, 4  ;;  %vm21_vm1 = vcmask 523264   ;;  %s30_s15 = int_to_ptr.vmem [resolvable:$true] %s29_s15 }
   0x4   :  { %s39_s16 = scalar_lea.vmem %s30_s15, 128  ;;  %p44_p1 = scmp.lt.s32.totalorder %s30_s15, %s30_s15 }
   0x5   :  { %p40_p0 = scmp.ne.s32.totalorder %s30_s15, %s39_s16  ;;  %p45_p2 = scmp.lt.s32.totalorder %s39_s16, %s39_s16 }
   0x7   :  { %p46_p3 = por %p45_p2, %p44_p1 }
   0x9   :  { %p47_p4 = pnand %p46_p3, %p40_p0 }
  0x75   :  { %v16_v2 = vpop.permute.xlu0 %15 }
  0x76   :  { %v19_v3 = vsel %vm18_vm0, %v13_v0, %v16_v2 }
  0x77   :  { %v20_v4 = vadd.f32 %v19_v3, %v12_v1 }
  0x79   :  { %22 = vst.msk [vmem:[#allocation2] sm:$0xff] %vm21_vm1, %v20_v4 }
  0x7a   :  { %50 = shalt.err (!%p47_p4)
}
  0x7b   :  { %s51_s18 = scalar_lea.hbm %s100_s2, 128 }
  0x7c   :  { %p52_p5 = scmp.ne.s32.totalorder %s100_s2, %s51_s18  ;;  %p55_p6 = scmp.lt.u32.totalorder %s51_s18, %s100_s2 }
  0x7e   :  { %p57_p7 = pnand %p55_p6, %p52_p5 }
  0x80   :  { %60 = shalt.err (!%p57_p7)
}
  0x81   :  { %32 = dma.vmem_to_hbm [thread:$0]  %s30_s15, 128, %s100_s2, [#allocation3]  }
  0x82   :  { %61 = dma.done.wait [#allocation3], 128  }
  0x83   :  { %62 = vsyncadd [#allocation3], 4294967168 }
  0x84   :  { %36 = vsyncpa [#allocation3], 1 }

</bundles_post_ra>
